<compile_context>
chip_gen: v6e
topology: v6e:2x2x1
jax: 0.10.0
libtpu: 0.0.40
codegen_flags: <defaults>
</compile_context>

<pallas_src>
import jax
import jax.numpy as jnp
from jax.experimental import pallas as pl
from jax.experimental.pallas import tpu as pltpu

_LANE = 128


def _head_kernel(x_ref, w_rd_ref, b_rd_ref, wo_ref, bo_ref, o_ref):
    # x_ref:    [TB, 2H]  CLS-token features (f32; cast to bf16 for the MXU)
    # w_rd_ref: [2H, H]   folded reduce+dense weight (bf16)
    # b_rd_ref: [1, H]    folded bias (f32)
    # wo_ref:   [H, Lp]   out_proj weight, lane-padded to 128 (bf16)
    # bo_ref:   [1, Lp]   out_proj bias, lane-padded (f32)
    x = x_ref[...].astype(w_rd_ref.dtype)
    h = jnp.dot(x, w_rd_ref[...], preferred_element_type=jnp.float32) + b_rd_ref[...]
    h = jnp.tanh(h)  # f32, EUP slot
    out = jnp.dot(h.astype(wo_ref.dtype), wo_ref[...],
                  preferred_element_type=jnp.float32) + bo_ref[...]
    o_ref[...] = out.astype(o_ref.dtype)


def prepare_head_params(params, weight_dtype=jnp.bfloat16):
    """One-time weight prep (NOT in the per-call path): fold reduce+dense,
    transpose to [in, out], zero-pad the label dim to 128 lanes, cast to bf16."""
    w_reduce = params["w_reduce"].astype(jnp.float32)   # [H, 2H]  (out, in)
    b_reduce = params["b_reduce"].astype(jnp.float32)   # [H]
    w_dense = params["w_dense"].astype(jnp.float32)     # [H, H]
    b_dense = params["b_dense"].astype(jnp.float32)     # [H]
    w_out = params["w_out"].astype(jnp.float32)         # [L, H]
    b_out = params["b_out"].astype(jnp.float32)         # [L]

    H = w_dense.shape[0]
    L = w_out.shape[0]
    L_pad = max(_LANE, ((L + _LANE - 1) // _LANE) * _LANE)

    # Fold (valid in eval mode only; dropout between reduce and dense is identity):
    #   (x @ Wr^T + br) @ Wd^T + bd == x @ (Wr^T Wd^T) + (br Wd^T + bd)
    w_rd = w_reduce.T @ w_dense.T                       # [2H, H]
    b_rd = b_reduce @ w_dense.T + b_dense               # [H]

    wo = jnp.zeros((H, L_pad), jnp.float32).at[:, :L].set(w_out.T)
    bo = jnp.zeros((1, L_pad), jnp.float32).at[:, :L].set(b_out[None, :])

    return {
        "w_rd": w_rd.astype(weight_dtype),              # [2H, H]  bf16
        "b_rd": b_rd[None, :].astype(jnp.float32),      # [1, H]   f32
        "w_out": wo.astype(weight_dtype),               # [H, Lp]  bf16 (zero-padded cols)
        "b_out": bo,                                    # [1, Lp]  f32
        "num_labels": L,                                # python int
    }


def roberta_classification_head(features, prepared, *, block_b=128):
    """features: [B, S, 2H]. prepared: output of prepare_head_params.
    Returns logits [B, num_labels] (eval mode: dropout = identity)."""
    # The head output only depends on the CLS token and every Linear is per-token,
    # so slicing token 0 first is exact.  This is a tiny [B, 2H] strided gather;
    # folding it into the input BlockSpec would require a second-minor block of 1,
    # which violates the (8,128) tiling rule when S is not the full block dim.
    x0 = features[:, 0, :]
    B, two_h = x0.shape

    w_rd, b_rd = prepared["w_rd"], prepared["b_rd"]
    wo, bo = prepared["w_out"], prepared["b_out"]
    H = w_rd.shape[1]
    L_pad = wo.shape[1]
    L = prepared["num_labels"]

    # Batch tile: 128 rows fills the MXU M dimension on all generations; small
    # batches run as one full block (block == full dim satisfies the (8,128) rule).
    # For large batches, pad B to a tile multiple so every grid block is full
    # (no partial-block reads/writes).
    if B <= block_b:
        tb, b_pad = B, B
    else:
        tb = block_b
        b_pad = int(pl.cdiv(B, tb)) * tb
        if b_pad != B:
            x0 = jnp.pad(x0, ((0, b_pad - B), (0, 0)))
    nb = b_pad // tb

    # VMEM budget estimate (double-buffered activation/output tiles + resident
    # bf16 weights).  Clamp the scoped limit to stay valid on v5e (16 MiB default)
    # through v7x (64 MiB physical).
    wbytes = jnp.dtype(w_rd.dtype).itemsize
    vmem_est = (
        2 * tb * two_h * 4                        # x tile, f32, double-buffered
        + 2 * tb * L_pad * 4                      # out tile, f32, double-buffered
        + 2 * (two_h * H + H * L_pad) * wbytes    # weights (worst-case 2 buffers)
        + 2 * (H + L_pad) * 4 * 2                 # biases
    )
    vmem_limit = int(min(max(2 * vmem_est, 32 * 1024 * 1024), 64 * 1024 * 1024))

    out_padded = pl.pallas_call(
        _head_kernel,
        out_shape=jax.ShapeDtypeStruct((b_pad, L_pad), jnp.float32),
        grid_spec=pltpu.PrefetchScalarGridSpec(
            num_scalar_prefetch=0,
            grid=(nb,),
            in_specs=[
                pl.BlockSpec((tb, two_h), lambda i: (i, 0)),   # activations: tiled over batch
                pl.BlockSpec((two_h, H), lambda i: (0, 0)),    # weights: constant index map ->
                pl.BlockSpec((1, H), lambda i: (0, 0)),        #   DMA'd once, stay resident
                pl.BlockSpec((H, L_pad), lambda i: (0, 0)),
                pl.BlockSpec((1, L_pad), lambda i: (0, 0)),
            ],
            out_specs=pl.BlockSpec((tb, L_pad), lambda i: (i, 0)),
        ),
        compiler_params=pltpu.CompilerParams(
            dimension_semantics=("parallel",),   # shard batch tiles across TCs (v7x megacore)
            vmem_limit_bytes=vmem_limit,
        ),
    )(x0, w_rd, b_rd, wo, bo)

    return out_padded[:B, :L]


def init_params(key, hidden_size, num_labels):
    ks = jax.random.split(key, 6)
    scale = 0.02
    return {
        "w_reduce": scale * jax.random.normal(ks[0], (hidden_size, 2 * hidden_size), jnp.float32),
        "b_reduce": scale * jax.random.normal(ks[1], (hidden_size,), jnp.float32),
        "w_dense":  scale * jax.random.normal(ks[2], (hidden_size, hidden_size), jnp.float32),
        "b_dense":  scale * jax.random.normal(ks[3], (hidden_size,), jnp.float32),
        "w_out":    scale * jax.random.normal(ks[4], (num_labels, hidden_size), jnp.float32),
        "b_out":    scale * jax.random.normal(ks[5], (num_labels,), jnp.float32),
    }


if __name__ == "__main__":
    B, S, H, L = 2, 8, 32, 3  # batch, seq, hidden_size, num_labels
    key = jax.random.PRNGKey(0)
    k_feat, k_param = jax.random.split(key)

    features = jax.random.normal(k_feat, (B, S, 2 * H), jnp.float32)
    params = init_params(k_param, H, L)

    # One-time weight prep (fold, transpose, pad, bf16) — outside the per-call path.
    prepared = prepare_head_params(params)

    logits = roberta_classification_head(features, prepared)
    jax.block_until_ready(logits)

    # Eval-mode reference (dropout = identity) in plain f32 JAX.
    x0 = features[:, 0, :]
    h = x0 @ params["w_reduce"].T + params["b_reduce"]
    h = jnp.tanh(h @ params["w_dense"].T + params["b_dense"])
    ref = h @ params["w_out"].T + params["b_out"]

    assert logits.shape == (B, L)
    max_err = float(jnp.max(jnp.abs(logits - ref)))
    assert jnp.allclose(logits, ref, atol=1e-3, rtol=1e-2), (
        f"mismatch vs reference: max abs err {max_err}")

    print("KERNEL_OK")
</pallas_src>

<mosaic_0001>
module attributes {stable_mosaic.version = 11 : i64} {
  func.func @_head_kernel(%arg0: i32, %arg1: memref<2x64xf32, #tpu.memory_space<vmem>>, %arg2: memref<64x32xbf16, #tpu.memory_space<vmem>>, %arg3: memref<1x32xf32, #tpu.memory_space<vmem>>, %arg4: memref<32x128xbf16, #tpu.memory_space<vmem>>, %arg5: memref<1x128xf32, #tpu.memory_space<vmem>>, %arg6: memref<2x128xf32, #tpu.memory_space<vmem>>) attributes {dimension_semantics = [#tpu.dimension_semantics<parallel>], iteration_bounds = array<i64: 1>, scalar_prefetch = 0 : i64, scratch_operands = 0 : i64, tpu.core_type = #tpu.core_type<tc>, window_params = [{transform_indices = @transform_0, window_bounds = array<i64: 2, 64>}, {pipeline_mode = #tpu.pipeline_mode<synchronous>, transform_indices = @transform_1, window_bounds = array<i64: 64, 32>}, {pipeline_mode = #tpu.pipeline_mode<synchronous>, transform_indices = @transform_2, window_bounds = array<i64: 1, 32>}, {pipeline_mode = #tpu.pipeline_mode<synchronous>, transform_indices = @transform_3, window_bounds = array<i64: 32, 128>}, {pipeline_mode = #tpu.pipeline_mode<synchronous>, transform_indices = @transform_4, window_bounds = array<i64: 1, 128>}, {transform_indices = @transform_5, window_bounds = array<i64: 2, 128>}]} {
    %c0 = arith.constant 0 : index
    %c0_0 = arith.constant 0 : index
    %0 = vector.load %arg1[%c0, %c0_0] : memref<2x64xf32, #tpu.memory_space<vmem>>, vector<2x64xf32>
    %1 = arith.truncf %0 : vector<2x64xf32> to vector<2x64xbf16>
    %c0_1 = arith.constant 0 : index
    %c0_2 = arith.constant 0 : index
    %2 = vector.load %arg2[%c0_1, %c0_2] : memref<64x32xbf16, #tpu.memory_space<vmem>>, vector<64x32xbf16>
    %cst = arith.constant dense<0.000000e+00> : vector<2x32xf32>
    %3 = tpu.matmul %1, %2, %cst {dimension_numbers = #tpu.dot_dimension_numbers<[1], [0], [0], [1], [0, 0, 1, 1], [], []>} : vector<2x64xbf16>, vector<64x32xbf16>, vector<2x32xf32> -> vector<2x32xf32>
    %c0_3 = arith.constant 0 : index
    %c0_4 = arith.constant 0 : index
    %4 = vector.load %arg3[%c0_3, %c0_4] : memref<1x32xf32, #tpu.memory_space<vmem>>, vector<1x32xf32>
    %5 = vector.broadcast %4 : vector<1x32xf32> to vector<2x32xf32>
    %6 = arith.addf %3, %5 : vector<2x32xf32>
    %7 = math.tanh %6 : vector<2x32xf32>
    %8 = arith.truncf %7 : vector<2x32xf32> to vector<2x32xbf16>
    %c0_5 = arith.constant 0 : index
    %c0_6 = arith.constant 0 : index
    %9 = vector.load %arg4[%c0_5, %c0_6] : memref<32x128xbf16, #tpu.memory_space<vmem>>, vector<32x128xbf16>
    %cst_7 = arith.constant dense<0.000000e+00> : vector<2x128xf32>
    %10 = tpu.matmul %8, %9, %cst_7 {dimension_numbers = #tpu.dot_dimension_numbers<[1], [0], [0], [1], [0, 0, 1, 1], [], []>} : vector<2x32xbf16>, vector<32x128xbf16>, vector<2x128xf32> -> vector<2x128xf32>
    %c0_8 = arith.constant 0 : index
    %c0_9 = arith.constant 0 : index
    %11 = vector.load %arg5[%c0_8, %c0_9] : memref<1x128xf32, #tpu.memory_space<vmem>>, vector<1x128xf32>
    %12 = vector.broadcast %11 : vector<1x128xf32> to vector<2x128xf32>
    %13 = arith.addf %10, %12 : vector<2x128xf32>
    %c0_10 = arith.constant 0 : index
    %c0_11 = arith.constant 0 : index
    %14 = vector.load %arg6[%c0_10, %c0_11] : memref<2x128xf32, #tpu.memory_space<vmem>>, vector<2x128xf32>
    tpu.vector_store %arg6[%c0_10, %c0_11], %13 {strides = array<i32>} : memref<2x128xf32, #tpu.memory_space<vmem>>, vector<2x128xf32>,
    return
  }
  func.func @transform_0(%arg0: i32) -> (i32, i32) {
    %c0_i32 = arith.constant 0 : i32
    %c0_i32_0 = arith.constant 0 : i32
    return %arg0, %c0_i32 : i32, i32
  }
  func.func @transform_1(%arg0: i32) -> (i32, i32) {
    %c0_i32 = arith.constant 0 : i32
    %c0_i32_0 = arith.constant 0 : i32
    %c0_i32_1 = arith.constant 0 : i32
    return %c0_i32, %c0_i32_0 : i32, i32
  }
  func.func @transform_2(%arg0: i32) -> (i32, i32) {
    %c0_i32 = arith.constant 0 : i32
    %c0_i32_0 = arith.constant 0 : i32
    %c0_i32_1 = arith.constant 0 : i32
    return %c0_i32, %c0_i32_0 : i32, i32
  }
  func.func @transform_3(%arg0: i32) -> (i32, i32) {
    %c0_i32 = arith.constant 0 : i32
    %c0_i32_0 = arith.constant 0 : i32
    %c0_i32_1 = arith.constant 0 : i32
    return %c0_i32, %c0_i32_0 : i32, i32
  }
  func.func @transform_4(%arg0: i32) -> (i32, i32) {
    %c0_i32 = arith.constant 0 : i32
    %c0_i32_0 = arith.constant 0 : i32
    %c0_i32_1 = arith.constant 0 : i32
    return %c0_i32, %c0_i32_0 : i32, i32
  }
  func.func @transform_5(%arg0: i32) -> (i32, i32) {
    %c0_i32 = arith.constant 0 : i32
    %c0_i32_0 = arith.constant 0 : i32
    return %arg0, %c0_i32 : i32, i32
  }
}

</mosaic_0001>

<bundles_post_ra>
// kernel: tpu_custom_call.1
= control target key start
LH: loop header
LB: loop body
LE: loop exit
PB: predicated region body
PF: predicated region fallthrough
CT: control target
= control target key end

     0   :  { %v262_v1 = vmov 0.0   ;;  %vm263_vm0 = vmmov 0   ;;  %s325_s0 = inlined_call_operand.vmem [shape: f32[2,64], index: 0, kind: input, shape index: {}]   ;;  %s326_s1 = inlined_call_operand.vmem [shape: bf16[64,32], index: 1, kind: input, shape index: {}]   ;;  %s327_s2 = inlined_call_operand.vmem [shape: f32[1,32], index: 2, kind: input, shape index: {}]   ;;  %s328_s3 = inlined_call_operand.vmem [shape: bf16[32,128], index: 3, kind: input, shape index: {}]   ;;  %s329_s4 = inlined_call_operand.vmem [shape: f32[1,128], index: 4, kind: input, shape index: {}]   ;;  %s330_s5 = inlined_call_operand.hbm [shape: f32[2,128], index: 5, kind: output, shape index: {}]  }
   0x1   :  { %v232_v0 = vld [vmem:[%s326_s1 + $0x18] sm:$0xff]   ;;  %209 = vmatprep.subr.bf16.mxu0 %v262_v1  ;;  %221 = vmatprep.subr.bf16.mxu1 %v262_v1  ;;  %v233_v2 = vld [vmem:[%s326_s1 + $0x10] sm:$0xff]   ;;  %v234_v3 = vld [vmem:[%s326_s1 + $0x8] sm:$0xff]  }
   0x2   :  { %210 = vmatpush3.bf16.msra.mxu0 %v232_v0  ;;  %217 = vmatprep.mubr.msk.bf16.mxu0 %vm263_vm0, %v262_v1 }
   0x3   :  { %211 = vmatprep.subr.bf16.mxu0 %v262_v1  ;;  %225 = vmatprep.mubr.msk.bf16.mxu1 %vm263_vm0, %v262_v1 }
   0x6   :  { %212 = vmatpush3.bf16.msra.mxu0 %v233_v2 }
   0x7   :  { %10 = vsyncpa [#allocation3], 0  ;;  %213 = vmatprep.subr.bf16.mxu0 %v262_v1  ;;  %v235_v4 = vld [vmem:[%s326_s1] sm:$0xff]   ;;  %vm63_vm1 = vcmask 523264   ;;  %v236_v7 = vld [vmem:[%s328_s3 + $0x8] sm:$0xff]   ;;  %vm132_vm2 = vcmask 261120  }
   0x8   :  { %v22_v5 = vld [vmem:[%s325_s0] sm:$0x3]  ;;  %222 = vmatpush3.bf16.msra.mxu1 %v236_v7 }
   0x9   :  { %v23_v6 = vpack.c.bf16 %v22_v5, %v22_v5  ;;  %223 = vmatprep.subr.bf16.mxu1 %v262_v1  ;;  %v237_v8 = vld [vmem:[%s328_s3] sm:$0xff]   ;;  %s264_s3 = smov [#allocation2]  }
   0xa   :  { %214 = vmatpush3.bf16.msra.mxu0 %v234_v3  ;;  %v191_v9 = vld [vmem:[%s327_s2] ss:$0 sm:$0xff]  ;;  %s183_s9 = sshll.u32 %s264_s3, 4  ;;  %s184_s9 = int_to_ptr.vmem [resolvable:$true] %s183_s9 }
   0xb   :  { %215 = vmatprep.subr.bf16.mxu0 %v262_v1  ;;  %v197_v17 = vld [vmem:[%s329_s4] ss:$0 sm:$0xff]  ;;  %s240_s2 = scalar_lea.vmem %s184_s9, 32  ;;  %p245_p1 = scmp.lt.s32.totalorder %s184_s9, %s184_s9 }
   0xc   :  { %224 = vmatpush3.bf16.msra.mxu1 %v237_v8  ;;  %p241_p0 = scmp.ne.s32.totalorder %s184_s9, %s240_s2  ;;  %p246_p2 = scmp.lt.s32.totalorder %s240_s2, %s240_s2 }
   0xe   :  { %216 = vmatpush3.bf16.msra.mxu0 %v235_v4  ;;  %p247_p3 = por %p246_p2, %p245_p1 }
  0x10   :  { %p248_p4 = pnand %p247_p3, %p241_p0 }
  0x11   :  { %218 = vmatmul.mubr.msk.bf16.vlgmr.msra.gmra.mxu0 %vm63_vm1, %v23_v6 }
  0xd1   :  { %v101_v10 = vpop.f32.mrf.mxu0 }
  0xd2   :  { %v102_v11 = vadd.f32 %v191_v9, %v101_v10 }
  0xd3   :  { %v219_v12 = vpop.f32.mrf.mxu0 }
  0xd4   :  { %238 = vtanh.f32 %v102_v11 }
  0xd5   :  { %v104_v13 = vpop.f32.mrf.mxu0 }
  0xd7   :  { %v220_v14 = vpop.f32.mrf.mxu0 }
  0xe1   :  { %v239_v15 = vpop.eup %238 }
  0xe2   :  { %v108_v16 = vpack.c.bf16 %v239_v15, %v239_v15 }
  0xe4   :  { %226 = vmatmul.mubr.msk.bf16.vlgmr.msra.gmra.mxu1 %vm132_vm2, %v108_v16 }
 0x1a4   :  { %v170_v18 = vpop.f32.mrf.mxu1 }
 0x1a5   :  { %v171_v19 = vadd.f32 %v197_v17, %v170_v18 }
 0x1a6   :  { %v227_v20 = vpop.f32.mrf.mxu1 }
 0x1a7   :  { %176 = vst [vmem:[#allocation2] sm:$0x3] %v171_v19 }
 0x1a8   :  { %v173_v21 = vpop.f32.mrf.mxu1 }
 0x1a9   :  { %251 = shalt.err (!%p248_p4)
}
 0x1aa   :  { %186 = dma.vmem_to_hbm [thread:$0]  %s184_s9, 32, %s330_s5, [#allocation3]   ;;  %v228_v22 = vpop.f32.mrf.mxu1 }
 0x1ab   :  { %260 = dma.done.wait [#allocation3], 32  }
 0x1ac   :  { %261 = vsyncadd [#allocation3], 4294967264 }
 0x1ad   :  { %190 = vsyncpa [#allocation3], 1 }

</bundles_post_ra>
